<compile_context>
chip_gen: v5e
topology: v5e:2x2
jax: 0.10.0
libtpu: 0.0.40
codegen_flags: <defaults>
</compile_context>

<pallas_src>
import functools

import jax
import jax.numpy as jnp
from jax.experimental import pallas as pl
from jax.experimental.pallas import tpu as pltpu

EPS = 1e-5  # nn.InstanceNorm2d default (affine=False, biased variance)


def _res_block_kernel(rc_ref, x_ref, w1_ref, w2_ref, o_ref, *, H, W, hw,
                      compute_dtype):
    x = x_ref[...]                                   # (rows, HW) = (Bn*C, HW)

    # (1, HW) row / column maps; the four edge masks stay (1, HW) and
    # broadcast over the sublane axis inside jnp.where.
    row = rc_ref[0:1, :]
    col = rc_ref[1:2, :]
    first_row = row == 0
    last_row = row == H - 1
    first_col = col == 0
    last_col = col == W - 1

    inv_hw = 1.0 / hw
    ones_col = jnp.ones((hw, 1), dtype=jnp.float32)  # MXU reduction vector

    def build_patches(a):
        """im2col: 9 reflect-padded taps of `a` -> (9*rows, HW), tap-major."""
        # pltpu.roll(a, s, axis=1)[:, p] == a[:, (p - s) % HW]  (np.roll).
        nxt_row = pltpu.roll(a, hw - W, axis=1)          # value at spatial p + W
        prv_row = pltpu.roll(a, W, axis=1)               # value at spatial p - W
        r_minus = jnp.where(first_row, nxt_row, prv_row)  # dy = 0 (reflect row 0->1)
        r_plus = jnp.where(last_row, prv_row, nxt_row)    # dy = 2 (reflect H-1->H-2)
        taps = []
        for r in (r_minus, a, r_plus):                   # dy = 0, 1, 2
            nxt_col = pltpu.roll(r, hw - 1, axis=1)      # value at x + 1
            prv_col = pltpu.roll(r, 1, axis=1)           # value at x - 1
            taps.append(jnp.where(first_col, nxt_col, prv_col))  # dx = 0
            taps.append(r)                                        # dx = 1
            taps.append(jnp.where(last_col, prv_col, nxt_col))   # dx = 2
        # rows (= Bn*C) is 8-aligned (wrapper guarantees), so these concat
        # offsets are sublane-aligned -> no relayout copies.
        return jnp.concatenate(taps, axis=0)             # (9*rows, HW)

    def conv3x3(a, w_ref):
        # Cast BEFORE building taps (bf16 path halves XLU/roll traffic and the
        # patch buffer).  Weights are pre-cast once in the wrapper.
        patches = build_patches(a.astype(compute_dtype))
        # Single fused im2col matmul; the weight is block-diagonal across the
        # Bn samples sharing this block.  f32 accumulation on the MXU.
        return jnp.dot(w_ref[...], patches, preferred_element_type=jnp.float32)

    def inst_norm(a):
        # Two-pass (numerically safe) per-(sample, channel) stats over the
        # lane axis.  Both reductions ride the otherwise-idle MXU (dot with a
        # ones vector), keeping the XLU free for the reflection-pad rolls.
        mean = jnp.dot(a, ones_col, preferred_element_type=jnp.float32) * inv_hw
        centered = a - mean
        var = jnp.dot(centered * centered, ones_col,
                      preferred_element_type=jnp.float32) * inv_hw
        return centered * jax.lax.rsqrt(var + EPS)

    h = jnp.maximum(inst_norm(conv3x3(x, w1_ref)), 0.0)
    h = inst_norm(conv3x3(h, w2_ref))
    o_ref[...] = (x + h).astype(o_ref.dtype)


def _choose_block_n(N, C, HW, itemsize):
    """Samples per grid step.  Requires (Bn*C) % 8 == 0 (or Bn == N) so the
    sublane axis is full / aligned, caps the im2col working set, and keeps
    >= 2 grid steps when possible for v7x's second TensorCore."""
    divisors = [d for d in range(1, N + 1) if N % d == 0]
    valid = [d for d in divisors if (d * C) % 8 == 0 or d == N]

    def ok(d):
        return d * C <= max(64, C) and 9 * d * C * HW * itemsize <= (4 << 20)

    fitting = [d for d in valid if ok(d)]
    bn = max(fitting) if fitting else min(valid)
    while (N // bn < 2 and bn % 2 == 0 and (bn // 2) in valid
           and ok(bn // 2) and (bn // 2) * C >= 8):
        bn //= 2
    return bn


def res_block(x_nchw, w1_oihw, b1, w2_oihw, b2, *, mxu_bf16=False):
    """x_nchw: (N, C, H, W) f32; weights: (C, C, 3, 3); biases: (C,).

    Conv biases are accepted for drop-in compatibility but unused: a bias
    added immediately before InstanceNorm2d(affine=False) is exactly
    cancelled by the mean subtraction.
    """
    del b1, b2  # mathematical no-op under the following InstanceNorm
    N, C, H, W = x_nchw.shape
    assert H >= 2 and W >= 2, "ReflectionPad2d(1) needs H >= 2 and W >= 2"
    HW = H * W

    compute_dtype = jnp.bfloat16 if mxu_bf16 else jnp.float32
    itemsize = jnp.dtype(compute_dtype).itemsize
    bn = _choose_block_n(N, C, HW, itemsize)
    rows = bn * C

    x2 = x_nchw.reshape(N * C, HW)        # free reshape (contiguous), no transpose

    def fused_weight(w_oihw):
        # (C_out, C_in, 3, 3) -> per-tap (9, C, C); tap index t = dy*3 + dx
        # matches the patch stacking order inside the kernel.
        w_taps = jnp.transpose(w_oihw, (2, 3, 0, 1)).reshape(9, C, C)
        # Block-diagonal across the bn samples sharing one grid block.
        eye = jnp.eye(bn, dtype=w_oihw.dtype)
        w_blk = jnp.einsum("toi,bd->tbodi", w_taps, eye).reshape(9, rows, rows)
        # Fuse the 9 taps along the contraction axis -> (rows, 9*rows).
        w_fused = jnp.transpose(w_blk, (1, 0, 2)).reshape(rows, 9 * rows)
        return w_fused.astype(compute_dtype)   # pre-cast once, no per-step cast

    w1_f = fused_weight(w1_oihw)
    w2_f = fused_weight(w2_oihw)

    # Static row / column index of each flattened spatial position, (2, HW).
    row_idx = jnp.repeat(jnp.arange(H, dtype=jnp.int32), W)
    col_idx = jnp.tile(jnp.arange(W, dtype=jnp.int32), H)
    rc = jnp.stack([row_idx, col_idx], axis=0)

    kernel = functools.partial(_res_block_kernel, H=H, W=W, hw=HW,
                               compute_dtype=compute_dtype)

    # Rough per-step working set: x/out double buffers + f32 intermediates,
    # taps + im2col buffer, two fused weights, rc map.
    blk = rows * HW
    est = (6 * blk * 4
           + 3 * 9 * blk * itemsize
           + 2 * rows * 9 * rows * itemsize
           + 2 * HW * 4)
    vmem_limit = int(min(96 << 20, max(32 << 20, 2 * est)))

    out = pl.pallas_call(
        kernel,
        out_shape=jax.ShapeDtypeStruct((N * C, HW), x2.dtype),
        grid_spec=pltpu.PrefetchScalarGridSpec(
            num_scalar_prefetch=0,
            grid=(N // bn,),
            in_specs=[
                pl.BlockSpec((2, HW), lambda n: (0, 0)),          # rc map
                pl.BlockSpec((rows, HW), lambda n: (n, 0)),       # x block
                pl.BlockSpec((rows, 9 * rows), lambda n: (0, 0)), # conv1 fused w
                pl.BlockSpec((rows, 9 * rows), lambda n: (0, 0)), # conv2 fused w
            ],
            out_specs=pl.BlockSpec((rows, HW), lambda n: (n, 0)),
        ),
        compiler_params=pltpu.CompilerParams(
            dimension_semantics=("parallel",),
            vmem_limit_bytes=vmem_limit),
    )(rc, x2, w1_f, w2_f)

    return out.reshape(N, C, H, W)


# ---------------- pure-JAX reference (for correctness check) ----------------
def _ref_res_block(x, w1, b1, w2, b2):
    def conv(a, w, b):
        ap = jnp.pad(a, ((0, 0), (0, 0), (1, 1), (1, 1)), mode="reflect")
        y = jax.lax.conv_general_dilated(
            ap, w, window_strides=(1, 1), padding="VALID",
            dimension_numbers=("NCHW", "OIHW", "NCHW"))
        return y + b[None, :, None, None]

    def inorm(a):
        m = jnp.mean(a, axis=(2, 3), keepdims=True)
        v = jnp.mean((a - m) ** 2, axis=(2, 3), keepdims=True)
        return (a - m) * jax.lax.rsqrt(v + EPS)

    h = jnp.maximum(inorm(conv(x, w1, b1)), 0.0)
    h = inorm(conv(h, w2, b2))
    return x + h


if __name__ == "__main__":
    N, C, H, W = 2, 4, 16, 16
    key = jax.random.PRNGKey(0)
    kx, k1, k2, k3, k4 = jax.random.split(key, 5)

    x = jax.random.normal(kx, (N, C, H, W), dtype=jnp.float32)
    # deterministic synthetic params (Conv2d default has bias=True)
    w1 = 0.1 * jax.random.normal(k1, (C, C, 3, 3), dtype=jnp.float32)
    b1 = 0.1 * jax.random.normal(k2, (C,), dtype=jnp.float32)
    w2 = 0.1 * jax.random.normal(k3, (C, C, 3, 3), dtype=jnp.float32)
    b2 = 0.1 * jax.random.normal(k4, (C,), dtype=jnp.float32)

    ref = _ref_res_block(x, w1, b1, w2, b2)

    # f32 path (default): bit-for-bit semantics of the PyTorch module.
    out = jax.block_until_ready(res_block(x, w1, b1, w2, b2))
    assert out.shape == (N, C, H, W)
    assert jnp.allclose(out, ref, atol=1e-3, rtol=1e-3), "f32 mismatch vs reference"

    # bf16 MXU-operand path (f32 accumulation): looser check, rounding only.
    out_bf16 = jax.block_until_ready(res_block(x, w1, b1, w2, b2, mxu_bf16=True))
    assert out_bf16.shape == (N, C, H, W)
    assert bool(jnp.all(jnp.isfinite(out_bf16)))
    assert jnp.allclose(out_bf16, ref, atol=2e-1, rtol=2e-1), "bf16 path grossly off"

    print("KERNEL_OK")
</pallas_src>

<mosaic_0001>
module attributes {stable_mosaic.version = 11 : i64} {
  func.func @_res_block_kernel(%arg0: i32, %arg1: memref<2x256xi32, #tpu.memory_space<vmem>>, %arg2: memref<8x256xf32, #tpu.memory_space<vmem>>, %arg3: memref<8x72xf32, #tpu.memory_space<vmem>>, %arg4: memref<8x72xf32, #tpu.memory_space<vmem>>, %arg5: memref<8x256xf32, #tpu.memory_space<vmem>>) attributes {dimension_semantics = [#tpu.dimension_semantics<parallel>], iteration_bounds = array<i64: 1>, scalar_prefetch = 0 : i64, scratch_operands = 0 : i64, tpu.core_type = #tpu.core_type<tc>, window_params = [{pipeline_mode = #tpu.pipeline_mode<synchronous>, transform_indices = @transform_0, window_bounds = array<i64: 2, 256>}, {transform_indices = @transform_1, window_bounds = array<i64: 8, 256>}, {pipeline_mode = #tpu.pipeline_mode<synchronous>, transform_indices = @transform_2, window_bounds = array<i64: 8, 72>}, {pipeline_mode = #tpu.pipeline_mode<synchronous>, transform_indices = @transform_3, window_bounds = array<i64: 8, 72>}, {transform_indices = @transform_4, window_bounds = array<i64: 8, 256>}]} {
    %c0 = arith.constant 0 : index
    %c0_0 = arith.constant 0 : index
    %0 = vector.load %arg2[%c0, %c0_0] : memref<8x256xf32, #tpu.memory_space<vmem>>, vector<8x256xf32>
    %c0_1 = arith.constant 0 : index
    %c0_2 = arith.constant 0 : index
    %1 = vector.load %arg1[%c0_1, %c0_2] : memref<2x256xi32, #tpu.memory_space<vmem>>, vector<1x256xi32>
    %c1 = arith.constant 1 : index
    %c0_3 = arith.constant 0 : index
    %2 = vector.load %arg1[%c1, %c0_3] : memref<2x256xi32, #tpu.memory_space<vmem>>, vector<1x256xi32>
    %c0_i32 = arith.constant 0 : i32
    %3 = vector.broadcast %c0_i32 : i32 to vector<1x256xi32>
    %4 = arith.cmpi eq, %1, %3 : vector<1x256xi32>
    %c15_i32 = arith.constant 15 : i32
    %5 = vector.broadcast %c15_i32 : i32 to vector<1x256xi32>
    %6 = arith.cmpi eq, %1, %5 : vector<1x256xi32>
    %c0_i32_4 = arith.constant 0 : i32
    %7 = vector.broadcast %c0_i32_4 : i32 to vector<1x256xi32>
    %8 = arith.cmpi eq, %2, %7 : vector<1x256xi32>
    %c15_i32_5 = arith.constant 15 : i32
    %9 = vector.broadcast %c15_i32_5 : i32 to vector<1x256xi32>
    %10 = arith.cmpi eq, %2, %9 : vector<1x256xi32>
    %cst = arith.constant 1.000000e+00 : f32
    %11 = vector.broadcast %cst : f32 to vector<256x1xf32>
    %c240_i32 = arith.constant 240 : i32
    %12 = tpu.dynamic_rotate %0 by %c240_i32 dim 1 : vector<8x256xf32>, i32 -> vector<8x256xf32>
    %c16_i32 = arith.constant 16 : i32
    %13 = tpu.dynamic_rotate %0 by %c16_i32 dim 1 : vector<8x256xf32>, i32 -> vector<8x256xf32>
    %14 = vector.shape_cast %4 : vector<1x256xi1> to vector<1x256xi1>
    %15 = vector.broadcast %14 : vector<1x256xi1> to vector<8x256xi1>
    %16 = arith.select %15, %12, %13 : vector<8x256xi1>, vector<8x256xf32>
    %17 = vector.shape_cast %6 : vector<1x256xi1> to vector<1x256xi1>
    %18 = vector.broadcast %17 : vector<1x256xi1> to vector<8x256xi1>
    %19 = arith.select %18, %13, %12 : vector<8x256xi1>, vector<8x256xf32>
    %c255_i32 = arith.constant 255 : i32
    %20 = tpu.dynamic_rotate %16 by %c255_i32 dim 1 : vector<8x256xf32>, i32 -> vector<8x256xf32>
    %c1_i32 = arith.constant 1 : i32
    %21 = tpu.dynamic_rotate %16 by %c1_i32 dim 1 : vector<8x256xf32>, i32 -> vector<8x256xf32>
    %22 = vector.shape_cast %8 : vector<1x256xi1> to vector<1x256xi1>
    %23 = vector.broadcast %22 : vector<1x256xi1> to vector<8x256xi1>
    %24 = arith.select %23, %20, %21 : vector<8x256xi1>, vector<8x256xf32>
    %25 = vector.shape_cast %10 : vector<1x256xi1> to vector<1x256xi1>
    %26 = vector.broadcast %25 : vector<1x256xi1> to vector<8x256xi1>
    %27 = arith.select %26, %21, %20 : vector<8x256xi1>, vector<8x256xf32>
    %c255_i32_6 = arith.constant 255 : i32
    %28 = tpu.dynamic_rotate %0 by %c255_i32_6 dim 1 : vector<8x256xf32>, i32 -> vector<8x256xf32>
    %c1_i32_7 = arith.constant 1 : i32
    %29 = tpu.dynamic_rotate %0 by %c1_i32_7 dim 1 : vector<8x256xf32>, i32 -> vector<8x256xf32>
    %30 = vector.shape_cast %8 : vector<1x256xi1> to vector<1x256xi1>
    %31 = vector.broadcast %30 : vector<1x256xi1> to vector<8x256xi1>
    %32 = arith.select %31, %28, %29 : vector<8x256xi1>, vector<8x256xf32>
    %33 = vector.shape_cast %10 : vector<1x256xi1> to vector<1x256xi1>
    %34 = vector.broadcast %33 : vector<1x256xi1> to vector<8x256xi1>
    %35 = arith.select %34, %29, %28 : vector<8x256xi1>, vector<8x256xf32>
    %c255_i32_8 = arith.constant 255 : i32
    %36 = tpu.dynamic_rotate %19 by %c255_i32_8 dim 1 : vector<8x256xf32>, i32 -> vector<8x256xf32>
    %c1_i32_9 = arith.constant 1 : i32
    %37 = tpu.dynamic_rotate %19 by %c1_i32_9 dim 1 : vector<8x256xf32>, i32 -> vector<8x256xf32>
    %38 = vector.shape_cast %8 : vector<1x256xi1> to vector<1x256xi1>
    %39 = vector.broadcast %38 : vector<1x256xi1> to vector<8x256xi1>
    %40 = arith.select %39, %36, %37 : vector<8x256xi1>, vector<8x256xf32>
    %41 = vector.shape_cast %10 : vector<1x256xi1> to vector<1x256xi1>
    %42 = vector.broadcast %41 : vector<1x256xi1> to vector<8x256xi1>
    %43 = arith.select %42, %37, %36 : vector<8x256xi1>, vector<8x256xf32>
    %44 = tpu.concatenate %24, %16, %27, %32, %0, %35, %40, %19, %43 in 0 : vector<8x256xf32>, vector<8x256xf32>, vector<8x256xf32>, vector<8x256xf32>, vector<8x256xf32>, vector<8x256xf32>, vector<8x256xf32>, vector<8x256xf32>, vector<8x256xf32> -> vector<72x256xf32>
    %c0_10 = arith.constant 0 : index
    %c0_11 = arith.constant 0 : index
    %45 = vector.load %arg3[%c0_10, %c0_11] : memref<8x72xf32, #tpu.memory_space<vmem>>, vector<8x72xf32>
    %cst_12 = arith.constant dense<0.000000e+00> : vector<8x256xf32>
    %46 = tpu.matmul %45, %44, %cst_12 {dimension_numbers = #tpu.dot_dimension_numbers<[1], [0], [0], [1], [0, 0, 1, 1], [], []>} : vector<8x72xf32>, vector<72x256xf32>, vector<8x256xf32> -> vector<8x256xf32>
    %cst_13 = arith.constant dense<0.000000e+00> : vector<8x1xf32>
    %47 = tpu.matmul %46, %11, %cst_13 {dimension_numbers = #tpu.dot_dimension_numbers<[1], [0], [0], [1], [0, 0, 1, 1], [], []>} : vector<8x256xf32>, vector<256x1xf32>, vector<8x1xf32> -> vector<8x1xf32>
    %cst_14 = arith.constant 3.906250e-03 : f32
    %48 = vector.broadcast %cst_14 : f32 to vector<8x1xf32>
    %49 = arith.mulf %47, %48 : vector<8x1xf32>
    %50 = vector.broadcast %49 : vector<8x1xf32> to vector<8x256xf32>
    %51 = arith.subf %46, %50 : vector<8x256xf32>
    %52 = arith.mulf %51, %51 : vector<8x256xf32>
    %cst_15 = arith.constant dense<0.000000e+00> : vector<8x1xf32>
    %53 = tpu.matmul %52, %11, %cst_15 {dimension_numbers = #tpu.dot_dimension_numbers<[1], [0], [0], [1], [0, 0, 1, 1], [], []>} : vector<8x256xf32>, vector<256x1xf32>, vector<8x1xf32> -> vector<8x1xf32>
    %cst_16 = arith.constant 3.906250e-03 : f32
    %54 = vector.broadcast %cst_16 : f32 to vector<8x1xf32>
    %55 = arith.mulf %53, %54 : vector<8x1xf32>
    %cst_17 = arith.constant 9.99999974E-6 : f32
    %56 = vector.broadcast %cst_17 : f32 to vector<8x1xf32>
    %57 = arith.addf %55, %56 : vector<8x1xf32>
    %58 = math.rsqrt %57 : vector<8x1xf32>
    %59 = vector.broadcast %58 : vector<8x1xf32> to vector<8x256xf32>
    %60 = arith.mulf %51, %59 : vector<8x256xf32>
    %cst_18 = arith.constant 0.000000e+00 : f32
    %61 = vector.broadcast %cst_18 : f32 to vector<8x256xf32>
    %62 = arith.maximumf %60, %61 : vector<8x256xf32>
    %c240_i32_19 = arith.constant 240 : i32
    %63 = tpu.dynamic_rotate %62 by %c240_i32_19 dim 1 : vector<8x256xf32>, i32 -> vector<8x256xf32>
    %c16_i32_20 = arith.constant 16 : i32
    %64 = tpu.dynamic_rotate %62 by %c16_i32_20 dim 1 : vector<8x256xf32>, i32 -> vector<8x256xf32>
    %65 = vector.shape_cast %4 : vector<1x256xi1> to vector<1x256xi1>
    %66 = vector.broadcast %65 : vector<1x256xi1> to vector<8x256xi1>
    %67 = arith.select %66, %63, %64 : vector<8x256xi1>, vector<8x256xf32>
    %68 = vector.shape_cast %6 : vector<1x256xi1> to vector<1x256xi1>
    %69 = vector.broadcast %68 : vector<1x256xi1> to vector<8x256xi1>
    %70 = arith.select %69, %64, %63 : vector<8x256xi1>, vector<8x256xf32>
    %c255_i32_21 = arith.constant 255 : i32
    %71 = tpu.dynamic_rotate %67 by %c255_i32_21 dim 1 : vector<8x256xf32>, i32 -> vector<8x256xf32>
    %c1_i32_22 = arith.constant 1 : i32
    %72 = tpu.dynamic_rotate %67 by %c1_i32_22 dim 1 : vector<8x256xf32>, i32 -> vector<8x256xf32>
    %73 = vector.shape_cast %8 : vector<1x256xi1> to vector<1x256xi1>
    %74 = vector.broadcast %73 : vector<1x256xi1> to vector<8x256xi1>
    %75 = arith.select %74, %71, %72 : vector<8x256xi1>, vector<8x256xf32>
    %76 = vector.shape_cast %10 : vector<1x256xi1> to vector<1x256xi1>
    %77 = vector.broadcast %76 : vector<1x256xi1> to vector<8x256xi1>
    %78 = arith.select %77, %72, %71 : vector<8x256xi1>, vector<8x256xf32>
    %c255_i32_23 = arith.constant 255 : i32
    %79 = tpu.dynamic_rotate %62 by %c255_i32_23 dim 1 : vector<8x256xf32>, i32 -> vector<8x256xf32>
    %c1_i32_24 = arith.constant 1 : i32
    %80 = tpu.dynamic_rotate %62 by %c1_i32_24 dim 1 : vector<8x256xf32>, i32 -> vector<8x256xf32>
    %81 = vector.shape_cast %8 : vector<1x256xi1> to vector<1x256xi1>
    %82 = vector.broadcast %81 : vector<1x256xi1> to vector<8x256xi1>
    %83 = arith.select %82, %79, %80 : vector<8x256xi1>, vector<8x256xf32>
    %84 = vector.shape_cast %10 : vector<1x256xi1> to vector<1x256xi1>
    %85 = vector.broadcast %84 : vector<1x256xi1> to vector<8x256xi1>
    %86 = arith.select %85, %80, %79 : vector<8x256xi1>, vector<8x256xf32>
    %c255_i32_25 = arith.constant 255 : i32
    %87 = tpu.dynamic_rotate %70 by %c255_i32_25 dim 1 : vector<8x256xf32>, i32 -> vector<8x256xf32>
    %c1_i32_26 = arith.constant 1 : i32
    %88 = tpu.dynamic_rotate %70 by %c1_i32_26 dim 1 : vector<8x256xf32>, i32 -> vector<8x256xf32>
    %89 = vector.shape_cast %8 : vector<1x256xi1> to vector<1x256xi1>
    %90 = vector.broadcast %89 : vector<1x256xi1> to vector<8x256xi1>
    %91 = arith.select %90, %87, %88 : vector<8x256xi1>, vector<8x256xf32>
    %92 = vector.shape_cast %10 : vector<1x256xi1> to vector<1x256xi1>
    %93 = vector.broadcast %92 : vector<1x256xi1> to vector<8x256xi1>
    %94 = arith.select %93, %88, %87 : vector<8x256xi1>, vector<8x256xf32>
    %95 = tpu.concatenate %75, %67, %78, %83, %62, %86, %91, %70, %94 in 0 : vector<8x256xf32>, vector<8x256xf32>, vector<8x256xf32>, vector<8x256xf32>, vector<8x256xf32>, vector<8x256xf32>, vector<8x256xf32>, vector<8x256xf32>, vector<8x256xf32> -> vector<72x256xf32>
    %c0_27 = arith.constant 0 : index
    %c0_28 = arith.constant 0 : index
    %96 = vector.load %arg4[%c0_27, %c0_28] : memref<8x72xf32, #tpu.memory_space<vmem>>, vector<8x72xf32>
    %cst_29 = arith.constant dense<0.000000e+00> : vector<8x256xf32>
    %97 = tpu.matmul %96, %95, %cst_29 {dimension_numbers = #tpu.dot_dimension_numbers<[1], [0], [0], [1], [0, 0, 1, 1], [], []>} : vector<8x72xf32>, vector<72x256xf32>, vector<8x256xf32> -> vector<8x256xf32>
    %cst_30 = arith.constant dense<0.000000e+00> : vector<8x1xf32>
    %98 = tpu.matmul %97, %11, %cst_30 {dimension_numbers = #tpu.dot_dimension_numbers<[1], [0], [0], [1], [0, 0, 1, 1], [], []>} : vector<8x256xf32>, vector<256x1xf32>, vector<8x1xf32> -> vector<8x1xf32>
    %cst_31 = arith.constant 3.906250e-03 : f32
    %99 = vector.broadcast %cst_31 : f32 to vector<8x1xf32>
    %100 = arith.mulf %98, %99 : vector<8x1xf32>
    %101 = vector.broadcast %100 : vector<8x1xf32> to vector<8x256xf32>
    %102 = arith.subf %97, %101 : vector<8x256xf32>
    %103 = arith.mulf %102, %102 : vector<8x256xf32>
    %cst_32 = arith.constant dense<0.000000e+00> : vector<8x1xf32>
    %104 = tpu.matmul %103, %11, %cst_32 {dimension_numbers = #tpu.dot_dimension_numbers<[1], [0], [0], [1], [0, 0, 1, 1], [], []>} : vector<8x256xf32>, vector<256x1xf32>, vector<8x1xf32> -> vector<8x1xf32>
    %cst_33 = arith.constant 3.906250e-03 : f32
    %105 = vector.broadcast %cst_33 : f32 to vector<8x1xf32>
    %106 = arith.mulf %104, %105 : vector<8x1xf32>
    %cst_34 = arith.constant 9.99999974E-6 : f32
    %107 = vector.broadcast %cst_34 : f32 to vector<8x1xf32>
    %108 = arith.addf %106, %107 : vector<8x1xf32>
    %109 = math.rsqrt %108 : vector<8x1xf32>
    %110 = vector.broadcast %109 : vector<8x1xf32> to vector<8x256xf32>
    %111 = arith.mulf %102, %110 : vector<8x256xf32>
    %112 = arith.addf %0, %111 : vector<8x256xf32>
    %c0_35 = arith.constant 0 : index
    %c0_36 = arith.constant 0 : index
    %113 = vector.load %arg5[%c0_35, %c0_36] : memref<8x256xf32, #tpu.memory_space<vmem>>, vector<8x256xf32>
    tpu.vector_store %arg5[%c0_35, %c0_36], %112 {strides = array<i32>} : memref<8x256xf32, #tpu.memory_space<vmem>>, vector<8x256xf32>,
    return
  }
  func.func @transform_0(%arg0: i32) -> (i32, i32) {
    %c0_i32 = arith.constant 0 : i32
    %c0_i32_0 = arith.constant 0 : i32
    %c0_i32_1 = arith.constant 0 : i32
    return %c0_i32, %c0_i32_0 : i32, i32
  }
  func.func @transform_1(%arg0: i32) -> (i32, i32) {
    %c0_i32 = arith.constant 0 : i32
    %c0_i32_0 = arith.constant 0 : i32
    return %arg0, %c0_i32 : i32, i32
  }
  func.func @transform_2(%arg0: i32) -> (i32, i32) {
    %c0_i32 = arith.constant 0 : i32
    %c0_i32_0 = arith.constant 0 : i32
    %c0_i32_1 = arith.constant 0 : i32
    return %c0_i32, %c0_i32_0 : i32, i32
  }
  func.func @transform_3(%arg0: i32) -> (i32, i32) {
    %c0_i32 = arith.constant 0 : i32
    %c0_i32_0 = arith.constant 0 : i32
    %c0_i32_1 = arith.constant 0 : i32
    return %c0_i32, %c0_i32_0 : i32, i32
  }
  func.func @transform_4(%arg0: i32) -> (i32, i32) {
    %c0_i32 = arith.constant 0 : i32
    %c0_i32_0 = arith.constant 0 : i32
    return %arg0, %c0_i32 : i32, i32
  }
}

</mosaic_0001>

<bundles_post_ra>
// kernel: tpu_custom_call.1
= control target key start
LH: loop header
LB: loop body
LE: loop exit
PB: predicated region body
PF: predicated region fallthrough
CT: control target
= control target key end

     0   :  { %9 = vsyncpa [#allocation3], 0  ;;  %s1202_s0 = inlined_call_operand.hbm [shape: s32[2,256], index: 0, kind: input, shape index: {}]   ;;  %s1203_s1 = inlined_call_operand.hbm [shape: f32[8,256], index: 1, kind: input, shape index: {}]   ;;  %s1204_s2 = inlined_call_operand.hbm [shape: f32[8,72], index: 2, kind: input, shape index: {}]   ;;  %s1205_s3 = inlined_call_operand.hbm [shape: f32[8,72], index: 3, kind: input, shape index: {}]   ;;  %s1206_s4 = inlined_call_operand.hbm [shape: f32[8,256], index: 4, kind: output, shape index: {}]  }
   0x1   :  { %10 = vsyncpa [#allocation6], 0 }
   0x2   :  { %11 = vsyncpa [#allocation9], 0  ;;  %s29_s17 = sshll.u32 %s1203_s1, 4  ;;  %s30_s17 = int_to_ptr.hbm [resolvable:$true] %s29_s17 }
   0x3   :  { %12 = vsyncpa [#allocation4], 0  ;;  %s798_s18 = smov [#allocation5]   ;;  %s18_s22 = sshll.u32 %s1202_s0, 4  ;;  %s19_s22 = int_to_ptr.hbm [resolvable:$true] %s18_s22 }
   0x4   :  { %s31_s19 = sshll.u32 %s798_s18, 4  ;;  %s799_s23 = smov [#allocation2]   ;;  %s32_s19 = int_to_ptr.vmem [resolvable:$true] %s31_s19 }
   0x5   :  { %34 = dma.hbm_to_vmem [thread:$0]  %s30_s17, 256, %s32_s19, [#allocation6]  }
   0x6   :  { %s20_s24 = sshll.u32 %s799_s23, 4  ;;  %s40_s27 = sshll.u32 %s1204_s2, 4  ;;  %s21_s24 = int_to_ptr.vmem [resolvable:$true] %s20_s24  ;;  %s41_s27 = int_to_ptr.hbm [resolvable:$true] %s40_s27 }
   0x7   :  { %23 = dma.hbm_to_vmem [thread:$0]  %s19_s22, 64, %s21_s24, [#allocation3]  }
   0x8   :  { %s51_s29 = sshll.u32 %s1205_s3, 4  ;;  %s800_s30 = smov [#allocation7]   ;;  %s52_s29 = int_to_ptr.hbm [resolvable:$true] %s51_s29 }
   0x9   :  { %s42_s5 = sshll.u32 %s800_s30, 4  ;;  %s801_s0 = smov [#allocation8]   ;;  %s43_s5 = int_to_ptr.vmem [resolvable:$true] %s42_s5 }
   0xa   :  { %45 = dma.hbm_to_vmem [thread:$0]  %s41_s27, 128, %s43_s5, [#allocation6]  }
   0xb   :  { %s53_s6 = sshll.u32 %s801_s0, 4  ;;  %s54_s6 = int_to_ptr.vmem [resolvable:$true] %s53_s6 }
   0xc   :  { %56 = dma.hbm_to_vmem [thread:$0]  %s52_s29, 128, %s54_s6, [#allocation9]  }
   0xd   :  { %790 = dma.done.wait [#allocation3], 64  }
   0xe   :  { %791 = vsyncadd [#allocation3], 4294967232 }
   0xf   :  { %792 = dma.done.wait [#allocation6], 384  }
  0x10   :  { %793 = vsyncadd [#allocation6], 4294966912 }
  0x11   :  { %794 = dma.done.wait [#allocation9], 128  }
  0x12   :  { %795 = vsyncadd [#allocation9], 4294967168  ;;  %v846_v0 = vld [vmem:[#allocation5] sm:$0xff]  ;;  %v848_v1 = vld [vmem:[#allocation5 + $0x8] sm:$0xff]  ;;  %s802_s2 = smov 112   ;;  %s803_s3 = smov 16   ;;  %v86_v6 = vlaneseq }
  0x13   :  { %v583_v2 = vpack.i.bf16 %v848_v1, %v846_v0  ;;  %v804_v3 = vmov 0   ;;  %v75_v4 = vld [vmem:[#allocation2] ss:$2 sm:$0x3]  ;;  %s805_s7 = smov 127   ;;  %s806_s8 = smov 1  }
  0x14   :  { %623 = vset.pattern.permute.xlu2 %v804_v3  ;;  %624 = vset.pattern.permute.xlu0 %v804_v3  ;;  %vm79_vm0 = vcmp.eq.s32.totalorder %v75_v4, 15  ;;  %vm78_vm1 = vcmp.eq.s32.totalorder %v75_v4, 0  ;;  %v860_v9 = vand.u32 127, %v86_v6  ;;  %v77_v34 = vld [vmem:[#allocation2 + $0x1] ss:$2 sm:$0x3] }
  0x15   :  { %584 = vrot.lane.b32.xlu0 %v583_v2, %s802_s2  ;;  %665 = vset.pattern.permute.xlu1 %v804_v3  ;;  %v105_v7 = vsel %vm79_vm0, 1, %v804_v3  ;;  %v98_v8 = vsel %vm78_vm1, 1, %v804_v3  ;;  %v807_v35 = vmov 1.0   ;;  %vm81_vm8 = vcmp.eq.s32.totalorder %v77_v34, 15  ;;  %s808_s9 = smov [#allocation10]   ;;  %s556_s13 = sshll.u32 %s1206_s4, 4  ;;  %s557_s13 = int_to_ptr.hbm [resolvable:$true] %s556_s13 }
  0x16   :  { %604 = vrot.lane.b32.xlu2 %v583_v2, %s805_s7  ;;  %v106_v10 = vperm.slane %v105_v7, 0  ;;  %v107_v11 = vperm.slane %v105_v7, 1  ;;  %v99_v12 = vperm.slane %v98_v8, 0  ;;  %v100_v13 = vperm.slane %v98_v8, 1  ;;  %217 = vmatpush.msra.mxu2 %v807_v35  ;;  %s554_s10 = sshll.u32 %s808_s9, 4  ;;  %s555_s10 = int_to_ptr.vmem [resolvable:$true] %s554_s10 }
  0x17   :  { %vm88_vm2 = vcmp.lt.s32.totalorder %v860_v9, 112  ;;  %vm95_vm3 = vcmp.lt.s32.totalorder %v860_v9, 16  ;;  %237 = vmatpush.msra.mxu3 %v807_v35  ;;  %v133_v37 = vsel %vm81_vm8, 1, %v804_v3  ;;  %vm80_vm9 = vcmp.eq.s32.totalorder %v77_v34, 0 }
  0x18   :  { %vm864_vm4 = vcmp.eq.s32.totalorder %v106_v10, 1  ;;  %vm868_vm5 = vcmp.eq.s32.totalorder %v107_v11, 1  ;;  %vm872_vm6 = vcmp.eq.s32.totalorder %v99_v12, 1  ;;  %vm876_vm7 = vcmp.eq.s32.totalorder %v100_v13, 1  ;;  %218 = vmatpush.msra.mxu2 %v807_v35 }
  0x19   :  { %238 = vmatpush.msra.mxu3 %v807_v35  ;;  %v134_v39 = vperm.slane %v133_v37, 0  ;;  %v135_v40 = vperm.slane %v133_v37, 1  ;;  %v126_v43 = vsel %vm80_vm9, 1, %v804_v3  ;;  %vm116_vm10 = vcmp.lt.s32.totalorder %v860_v9, 127 }
  0x1a   :  { %219 = vmatpush.msra.mxu2 %v807_v35  ;;  %vm123_vm11 = vcmp.lt.s32.totalorder %v860_v9, 1  ;;  %v127_v53 = vperm.slane %v126_v43, 0  ;;  %v128_v54 = vperm.slane %v126_v43, 1  ;;  %vm173_vm0 = vcmask 588800  }
  0x1b   :  { %239 = vmatpush.msra.mxu3 %v807_v35  ;;  %vm922_vm12 = vcmp.eq.s32.totalorder %v134_v39, 1  ;;  %vm926_vm13 = vcmp.eq.s32.totalorder %v135_v40, 1 }
  0x1c   :  { %220 = vmatpush.msra.mxu2 %v807_v35  ;;  %vm945_vm14 = vcmp.eq.s32.totalorder %v127_v53, 1  ;;  %vm953_vm15 = vcmp.eq.s32.totalorder %v128_v54, 1 }
  0x1d   :  { %589 = vrot.lane.b32.xlu0 %v583_v2, %s803_s3  ;;  %240 = vmatpush.msra.mxu3 %v807_v35 }
  0x1e   :  { %609 = vrot.lane.b32.xlu2 %v583_v2, %s806_s8  ;;  %221 = vmatpush.msra.mxu2 %v807_v35 }
  0x1f   :  { %241 = vmatpush.msra.mxu3 %v807_v35 }
  0x20   :  { %222 = vmatpush.msra.mxu2 %v807_v35 }
  0x21   :  { %242 = vmatpush.msra.mxu3 %v807_v35 }
  0x22   :  { %223 = vmatpush.msra.mxu2 %v807_v35 }
  0x23   :  { %243 = vmatpush.msra.mxu3 %v807_v35 }
  0x24   :  { %224 = vmatpush.msra.mxu2 %v807_v35 }
  0x25   :  { %244 = vmatpush.msra.mxu3 %v807_v35 }
  0x26   :  { %225 = vmatpush.msra.mxu2 %v807_v35 }
  0x27   :  { %245 = vmatpush.msra.mxu3 %v807_v35 }
  0x28   :  { %226 = vmatpush.msra.mxu2 %v807_v35 }
  0x29   :  { %246 = vmatpush.msra.mxu3 %v807_v35 }
  0x2a   :  { %227 = vmatpush.msra.mxu2 %v807_v35 }
  0x2b   :  { %247 = vmatpush.msra.mxu3 %v807_v35 }
  0x2c   :  { %228 = vmatpush.msra.mxu2 %v807_v35 }
  0x2d   :  { %248 = vmatpush.msra.mxu3 %v807_v35 }
  0x2e   :  { %229 = vmatpush.msra.mxu2 %v807_v35 }
  0x2f   :  { %249 = vmatpush.msra.mxu3 %v807_v35 }
  0x30   :  { %230 = vmatpush.msra.mxu2 %v807_v35 }
  0x31   :  { %250 = vmatpush.msra.mxu3 %v807_v35 }
  0x32   :  { %231 = vmatpush.msra.mxu2 %v807_v35 }
  0x33   :  { %251 = vmatpush.msra.mxu3 %v807_v35 }
  0x34   :  { %232 = vmatpush.msra.mxu2 %v807_v35 }
  0x35   :  { %252 = vmatpush.msra.mxu3 %v807_v35 }
  0x70   :  { %v605_v33 = vpop.permute.xlu2 %604 }
  0x71   :  { %v607_v44 = vunpack.i.h.bf16 %v605_v33  ;;  %v606_v45 = vunpack.i.l.bf16 %v605_v33 }
  0x73   :  { %v144_v62 = vsel %vm116_vm10, %v606_v45, %v607_v44  ;;  %v145_v3 = vsel %vm116_vm10, %v607_v44, %v606_v45 }
  0x78   :  { %v610_v38 = vpop.permute.xlu2 %609 }
  0x79   :  { %v612_v47 = vunpack.i.h.bf16 %v610_v38  ;;  %v611_v48 = vunpack.i.l.bf16 %v610_v38 }
  0x7b   :  { %v151_v2 = vsel %vm123_vm11, %v612_v47, %v611_v48  ;;  %v150_v4 = vsel %vm123_vm11, %v611_v48, %v612_v47 }
  0x7c   :  { %v154_v12 = vsel %vm922_vm12, %v151_v2, %v144_v62  ;;  %v155_v13 = vsel %vm926_vm13, %v150_v4, %v145_v3 }
  0x87   :  { %v585_v5 = vpop.permute.xlu0 %584 }
  0x88   :  { %v587_v14 = vunpack.i.h.bf16 %v585_v5  ;;  %v586_v15 = vunpack.i.l.bf16 %v585_v5 }
  0x8a   :  { %v89_v23 = vsel %vm88_vm2, %v586_v15, %v587_v14  ;;  %v90_v24 = vsel %vm88_vm2, %v587_v14, %v586_v15 }
  0x8f   :  { %v590_v16 = vpop.permute.xlu0 %589 }
  0x90   :  { %v592_v19 = vunpack.i.h.bf16 %v590_v16  ;;  %v591_v20 = vunpack.i.l.bf16 %v590_v16 }
  0x92   :  { %v96_v25 = vsel %vm95_vm3, %v591_v20, %v592_v19  ;;  %v97_v26 = vsel %vm95_vm3, %v592_v19, %v591_v20  ;;  %v152_v20 = vsel %vm945_vm14, %v144_v62, %v151_v2 }
  0x93   :  { %v110_v27 = vsel %vm864_vm4, %v97_v26, %v89_v23  ;;  %v111_v28 = vsel %vm868_vm5, %v96_v25, %v90_v24  ;;  %v895_v29 = vsel %vm872_vm6, %v89_v23, %v97_v26  ;;  %v899_v30 = vsel %vm876_vm7, %v90_v24, %v96_v25 }
  0x94   :  { %v593_v31 = vpack.i.bf16 %v111_v28, %v110_v27  ;;  %v613_v32 = vpack.i.bf16 %v899_v30, %v895_v29  ;;  %v153_v23 = vsel %vm953_vm15, %v145_v3, %v150_v4 }
  0x96   :  { %594 = vrot.lane.b32.xlu1 %v593_v31, %s805_s7  ;;  %614 = vrot.lane.b32.xlu0 %v613_v32, %s805_s7 }
  0x9e   :  { %599 = vrot.lane.b32.xlu1 %v593_v31, %s806_s8 }
  0xa6   :  { %619 = vrot.lane.b32.xlu1 %v613_v32, %s806_s8 }
 0x108   :  { %v595_v36 = vpop.permute.xlu1 %594  ;;  %v615_v5 = vpop.permute.xlu0 %614 }
 0x109   :  { %v597_v41 = vunpack.i.h.bf16 %v595_v36  ;;  %v596_v42 = vunpack.i.l.bf16 %v595_v36  ;;  %v617_v14 = vunpack.i.h.bf16 %v615_v5  ;;  %v616_v15 = vunpack.i.l.bf16 %v615_v5 }
 0x10b   :  { %v160_v55 = vsel %vm116_vm10, %v596_v42, %v597_v41  ;;  %v161_v57 = vsel %vm116_vm10, %v597_v41, %v596_v42  ;;  %v117_v24 = vsel %vm116_vm10, %v616_v15, %v617_v14  ;;  %v118_v25 = vsel %vm116_vm10, %v617_v14, %v616_v15 }
 0x110   :  { %v600_v46 = vpop.permute.xlu1 %599 }
 0x111   :  { %v602_v49 = vunpack.i.h.bf16 %v600_v46  ;;  %v601_v50 = vunpack.i.l.bf16 %v600_v46 }
 0x113   :  { %v167_v56 = vsel %vm123_vm11, %v602_v49, %v601_v50  ;;  %v166_v58 = vsel %vm123_vm11, %v601_v50, %v602_v49 }
 0x114   :  { %v170_v59 = vsel %vm922_vm12, %v167_v56, %v160_v55  ;;  %v171_v60 = vsel %vm926_vm13, %v166_v58, %v161_v57  ;;  %v168_v7 = vsel %vm945_vm14, %v160_v55, %v167_v56  ;;  %v169_v8 = vsel %vm953_vm15, %v161_v57, %v166_v58 }
 0x115   :  { %184 = vmatpush.msra.mxu0 %v170_v59  ;;  %204 = vmatpush.msra.mxu1 %v171_v60 }
 0x117   :  { %185 = vmatpush.msra.mxu0 %v110_v27  ;;  %205 = vmatpush.msra.mxu1 %v111_v28  ;;  %v172_v28 = vld [vmem:[#allocation7] sm:$0xff] }
 0x118   :  { %v620_v6 = vpop.permute.xlu1 %619 }
 0x119   :  { %v622_v10 = vunpack.i.h.bf16 %v620_v6  ;;  %v621_v11 = vunpack.i.l.bf16 %v620_v6  ;;  %186 = vmatpush.msra.mxu0 %v168_v7  ;;  %206 = vmatpush.msra.mxu1 %v169_v8 }
 0x11b   :  { %187 = vmatpush.msra.mxu0 %v154_v12  ;;  %207 = vmatpush.msra.mxu1 %v155_v13  ;;  %v125_v16 = vsel %vm123_vm11, %v622_v10, %v621_v11  ;;  %v124_v19 = vsel %vm123_vm11, %v621_v11, %v622_v10 }
 0x11c   :  { %v138_v26 = vsel %vm922_vm12, %v125_v16, %v117_v24  ;;  %v139_v27 = vsel %vm926_vm13, %v124_v19, %v118_v25  ;;  %v131_v31 = vsel %vm945_vm14, %v117_v24, %v125_v16  ;;  %v132_v32 = vsel %vm953_vm15, %v118_v25, %v124_v19 }
 0x11d   :  { %188 = vmatpush.msra.mxu0 %v846_v0  ;;  %208 = vmatpush.msra.mxu1 %v848_v1 }
 0x11f   :  { %189 = vmatpush.msra.mxu0 %v152_v20  ;;  %209 = vmatpush.msra.mxu1 %v153_v23 }
 0x121   :  { %190 = vmatpush.msra.mxu0 %v138_v26  ;;  %210 = vmatpush.msra.mxu1 %v139_v27 }
 0x123   :  { %191 = vmatpush.msra.mxu0 %v895_v29  ;;  %211 = vmatpush.msra.mxu1 %v899_v30 }
 0x125   :  { %192 = vmatpush.msra.mxu0 %v131_v31  ;;  %212 = vmatpush.msra.mxu1 %v132_v32 }
 0x126   :  { %568 = vmatmul.msk.f32.vlgmr.msra.gmra.mxu0 %vm173_vm0, %v172_v28  ;;  %569 = vmatmul.msk.f32.vlgmr.msra.gmra.mxu1 %vm173_vm0, %v172_v28 }
 0x127   :  { %267 = vmatpush.msrb.mxu0 %v807_v35  ;;  %287 = vmatpush.msrb.mxu1 %v807_v35 }
 0x129   :  { %268 = vmatpush.msrb.mxu0 %v807_v35  ;;  %288 = vmatpush.msrb.mxu1 %v807_v35 }
 0x12b   :  { %269 = vmatpush.msrb.mxu0 %v807_v35  ;;  %289 = vmatpush.msrb.mxu1 %v807_v35 }
 0x12d   :  { %270 = vmatpush.msrb.mxu0 %v807_v35  ;;  %290 = vmatpush.msrb.mxu1 %v807_v35 }
 0x12f   :  { %271 = vmatpush.msrb.mxu0 %v807_v35  ;;  %291 = vmatpush.msrb.mxu1 %v807_v35 }
 0x131   :  { %272 = vmatpush.msrb.mxu0 %v807_v35  ;;  %292 = vmatpush.msrb.mxu1 %v807_v35 }
 0x133   :  { %273 = vmatpush.msrb.mxu0 %v807_v35  ;;  %293 = vmatpush.msrb.mxu1 %v807_v35 }
 0x135   :  { %274 = vmatpush.msrb.mxu0 %v807_v35  ;;  %294 = vmatpush.msrb.mxu1 %v807_v35 }
 0x137   :  { %275 = vmatpush.msrb.mxu0 %v807_v35  ;;  %295 = vmatpush.msrb.mxu1 %v807_v35 }
 0x139   :  { %276 = vmatpush.msrb.mxu0 %v807_v35  ;;  %296 = vmatpush.msrb.mxu1 %v807_v35 }
 0x13b   :  { %277 = vmatpush.msrb.mxu0 %v807_v35  ;;  %297 = vmatpush.msrb.mxu1 %v807_v35 }
 0x13d   :  { %278 = vmatpush.msrb.mxu0 %v807_v35  ;;  %298 = vmatpush.msrb.mxu1 %v807_v35 }
 0x13f   :  { %279 = vmatpush.msrb.mxu0 %v807_v35  ;;  %299 = vmatpush.msrb.mxu1 %v807_v35 }
 0x141   :  { %280 = vmatpush.msrb.mxu0 %v807_v35  ;;  %300 = vmatpush.msrb.mxu1 %v807_v35 }
 0x143   :  { %281 = vmatpush.msrb.mxu0 %v807_v35  ;;  %301 = vmatpush.msrb.mxu1 %v807_v35 }
 0x145   :  { %282 = vmatpush.msrb.mxu0 %v807_v35  ;;  %302 = vmatpush.msrb.mxu1 %v807_v35 }
 0x147   :  { %436 = vmatpush.msra.mxu0 %v807_v35  ;;  %456 = vmatpush.msra.mxu1 %v807_v35 }
 0x149   :  { %437 = vmatpush.msra.mxu0 %v807_v35  ;;  %457 = vmatpush.msra.mxu1 %v807_v35 }
 0x14b   :  { %438 = vmatpush.msra.mxu0 %v807_v35  ;;  %458 = vmatpush.msra.mxu1 %v807_v35 }
 0x14d   :  { %439 = vmatpush.msra.mxu0 %v807_v35  ;;  %459 = vmatpush.msra.mxu1 %v807_v35 }
 0x14f   :  { %440 = vmatpush.msra.mxu0 %v807_v35  ;;  %460 = vmatpush.msra.mxu1 %v807_v35 }
 0x151   :  { %441 = vmatpush.msra.mxu0 %v807_v35  ;;  %461 = vmatpush.msra.mxu1 %v807_v35 }
 0x153   :  { %442 = vmatpush.msra.mxu0 %v807_v35  ;;  %462 = vmatpush.msra.mxu1 %v807_v35 }
 0x155   :  { %443 = vmatpush.msra.mxu0 %v807_v35  ;;  %463 = vmatpush.msra.mxu1 %v807_v35 }
 0x157   :  { %444 = vmatpush.msra.mxu0 %v807_v35  ;;  %464 = vmatpush.msra.mxu1 %v807_v35 }
 0x159   :  { %445 = vmatpush.msra.mxu0 %v807_v35  ;;  %465 = vmatpush.msra.mxu1 %v807_v35 }
 0x15b   :  { %446 = vmatpush.msra.mxu0 %v807_v35  ;;  %466 = vmatpush.msra.mxu1 %v807_v35 }
 0x15d   :  { %447 = vmatpush.msra.mxu0 %v807_v35  ;;  %467 = vmatpush.msra.mxu1 %v807_v35 }
 0x15f   :  { %448 = vmatpush.msra.mxu0 %v807_v35  ;;  %468 = vmatpush.msra.mxu1 %v807_v35 }
 0x161   :  { %449 = vmatpush.msra.mxu0 %v807_v35  ;;  %469 = vmatpush.msra.mxu1 %v807_v35 }
 0x163   :  { %450 = vmatpush.msra.mxu0 %v807_v35  ;;  %470 = vmatpush.msra.mxu1 %v807_v35 }
 0x165   :  { %451 = vmatpush.msra.mxu0 %v807_v35  ;;  %471 = vmatpush.msra.mxu1 %v807_v35 }
 0x1a3   :  { %v194_v29 = vpop.f32.mrf.mxu0  ;;  %v214_v30 = vpop.f32.mrf.mxu1 }
 0x1a4   :  { %233 = vmatmul.f32.vlgmr.msra.gmra.mxu2 %v194_v29  ;;  %253 = vmatmul.f32.vlgmr.msra.gmra.mxu3 %v214_v30 }
 0x227   :  { %v234_v33 = vpop.f32.mrf.mxu2  ;;  %v254_v34 = vpop.f32.mrf.mxu3 }
 0x228   :  { %v255_v36 = vadd.f32 %v254_v34, %v234_v33 }
 0x22a   :  { %v257_v37 = vmul.f32 0.00390625, %v255_v36 }
 0x22c   :  { %260 = vperm.xlu2 %623, %v257_v37  }
 0x286   :  { %v261_v38 = vpop.permute.xlu2 %260 }
 0x287   :  { %v263_v39 = vsub.f32 %v194_v29, %v261_v38  ;;  %v264_v40 = vsub.f32 %v214_v30, %v261_v38 }
 0x289   :  { %v265_v41 = vmul.f32 %v263_v39, %v263_v39  ;;  %v266_v42 = vmul.f32 %v264_v40, %v264_v40 }
 0x28b   :  { %283 = vmatmul.f32.vlgmr.msrb.gmra.mxu0 %v265_v41  ;;  %303 = vmatmul.f32.vlgmr.msrb.gmra.mxu1 %v266_v42 }
 0x308   :  { %v284_v43 = vpop.f32.mrf.mxu0  ;;  %v304_v44 = vpop.f32.mrf.mxu1 }
 0x309   :  { %v305_v45 = vadd.f32 %v304_v44, %v284_v43 }
 0x30b   :  { %v307_v46 = vmul.f32 0.00390625, %v305_v45 }
 0x30d   :  { %v308_v47 = vadd.f32 1e-05, %v307_v46 }
 0x30f   :  { %666 = vrsqrt.f32 %v308_v47  ;;  %vm315_vm8 = vweird.f32 %v308_v47 }
 0x315   :  { %v667_v48 = vpop.eup %666 }
 0x316   :  { %v310_v49 = vmul.f32 %v667_v48, %v308_v47  ;;  %vm316_vm1 = vweird.f32 %v667_v48 }
 0x317   :  { %vm317_vm9 = vmor %vm315_vm8, %vm316_vm1 }
 0x318   :  { %v311_v50 = vmul.f32 %v667_v48, %v310_v49 }
 0x31a   :  { %v312_v53 = vmul.f32 0.5, %v311_v50 }
 0x31c   :  { %v313_v54 = vsub.f32 1.5, %v312_v53 }
 0x31e   :  { %v314_v55 = vmul.f32 %v667_v48, %v313_v54 }
 0x320   :  { %v318_v56 = vsel %vm317_vm9, %v667_v48, %v314_v55 }
 0x321   :  { %321 = vperm.xlu0 %624, %v318_v56  }
 0x393   :  { %v322_v57 = vpop.permute.xlu0 %321 }
 0x394   :  { %v1077_v58 = vmul.f32 %v322_v57, %v263_v39  ;;  %v1079_v59 = vmul.f32 %v322_v57, %v264_v40 }
 0x396   :  { %v326_v60 = vmax.f32 %v1077_v58, 0.0  ;;  %v327_v62 = vmax.f32 %v1079_v59, 0.0 }
 0x398   :  { %v645_v2 = vpack.i.bf16 %v327_v62, %v326_v60 }
 0x39a   :  { %646 = vrot.lane.b32.xlu0 %v645_v2, %s805_s7  ;;  %631 = vrot.lane.b32.xlu2 %v645_v2, %s803_s3 }
 0x39b   :  { %626 = vrot.lane.b32.xlu1 %v645_v2, %s802_s2 }
 0x3f4   :  { %v632_v3 = vpop.permute.xlu2 %631 }
 0x3f5   :  { %v634_v4 = vunpack.i.h.bf16 %v632_v3  ;;  %v633_v5 = vunpack.i.l.bf16 %v632_v3  ;;  %v392_v3 = vld [vmem:[#allocation8] sm:$0xff] }
 0x3f7   :  { %v338_v10 = vsel %vm95_vm3, %v633_v5, %v634_v4  ;;  %v339_v11 = vsel %vm95_vm3, %v634_v4, %v633_v5 }
 0x40c   :  { %v647_v21 = vpop.permute.xlu0 %646 }
 0x40d   :  { %v627_v6 = vpop.permute.xlu1 %626  ;;  %v649_v33 = vunpack.i.h.bf16 %v647_v21  ;;  %v648_v34 = vunpack.i.l.bf16 %v647_v21 }
 0x40e   :  { %v629_v7 = vunpack.i.h.bf16 %v627_v6  ;;  %v628_v8 = vunpack.i.l.bf16 %v627_v6 }
 0x40f   :  { %v364_v43 = vsel %vm116_vm10, %v648_v34, %v649_v33  ;;  %v365_v44 = vsel %vm116_vm10, %v649_v33, %v648_v34 }
 0x410   :  { %v332_v12 = vsel %vm88_vm2, %v628_v8, %v629_v7  ;;  %v333_v13 = vsel %vm88_vm2, %v629_v7, %v628_v8 }
 0x411   :  { %v342_v14 = vsel %vm864_vm4, %v339_v11, %v332_v12  ;;  %v343_v15 = vsel %vm868_vm5, %v338_v10, %v333_v13  ;;  %v340_v16 = vsel %vm872_vm6, %v332_v12, %v339_v11  ;;  %v341_v19 = vsel %vm876_vm7, %v333_v13, %v338_v10 }
 0x412   :  { %v640_v20 = vpack.i.bf16 %v343_v15, %v342_v14  ;;  %v660_v23 = vpack.i.bf16 %v341_v19, %v340_v16 }
 0x414   :  { %641 = vrot.lane.b32.xlu2 %v640_v20, %s806_s8  ;;  %636 = vrot.lane.b32.xlu1 %v640_v20, %s805_s7 }
 0x415   :  { %661 = vrot.lane.b32.xlu0 %v660_v23, %s806_s8 }
 0x41c   :  { %651 = vrot.lane.b32.xlu1 %v645_v2, %s806_s8  ;;  %656 = vrot.lane.b32.xlu2 %v660_v23, %s805_s7 }
 0x46e   :  { %v642_v17 = vpop.permute.xlu2 %641 }
 0x46f   :  { %v644_v18 = vunpack.i.h.bf16 %v642_v17  ;;  %v643_v24 = vunpack.i.l.bf16 %v642_v17 }
 0x471   :  { %v387_v28 = vsel %vm123_vm11, %v644_v18, %v643_v24  ;;  %v386_v32 = vsel %vm123_vm11, %v643_v24, %v644_v18 }
 0x476   :  { %v657_v42 = vpop.permute.xlu2 %656 }
 0x477   :  { %v659_v53 = vunpack.i.h.bf16 %v657_v42  ;;  %v658_v54 = vunpack.i.l.bf16 %v657_v42 }
 0x479   :  { %v348_v58 = vsel %vm116_vm10, %v658_v54, %v659_v53  ;;  %v349_v59 = vsel %vm116_vm10, %v659_v53, %v658_v54 }
 0x486   :  { %v637_v25 = vpop.permute.xlu1 %636 }
 0x487   :  { %v639_v26 = vunpack.i.h.bf16 %v637_v25  ;;  %v638_v22 = vunpack.i.l.bf16 %v637_v25  ;;  %v662_v36 = vpop.permute.xlu0 %661 }
 0x488   :  { %v664_v45 = vunpack.i.h.bf16 %v662_v36  ;;  %v663_v46 = vunpack.i.l.bf16 %v662_v36 }
 0x489   :  { %v380_v27 = vsel %vm116_vm10, %v638_v22, %v639_v26  ;;  %v381_v31 = vsel %vm116_vm10, %v639_v26, %v638_v22 }
 0x48a   :  { %v390_v29 = vsel %vm922_vm12, %v387_v28, %v380_v27  ;;  %v391_v30 = vsel %vm926_vm13, %v386_v32, %v381_v31  ;;  %v388_v38 = vsel %vm945_vm14, %v380_v27, %v387_v28  ;;  %v389_v39 = vsel %vm953_vm15, %v381_v31, %v386_v32 }
 0x48b   :  { %403 = vmatpush.msrb.mxu2 %v390_v29  ;;  %423 = vmatpush.msrb.mxu3 %v391_v30  ;;  %v355_v55 = vsel %vm123_vm11, %v664_v45, %v663_v46  ;;  %v354_v56 = vsel %vm123_vm11, %v663_v46, %v664_v45 }
 0x48c   :  { %v356_v4 = vsel %vm945_vm14, %v348_v58, %v355_v55  ;;  %v357_v5 = vsel %vm953_vm15, %v349_v59, %v354_v56 }
 0x48d   :  { %404 = vmatpush.msrb.mxu2 %v342_v14  ;;  %424 = vmatpush.msrb.mxu3 %v343_v15 }
 0x48e   :  { %v652_v37 = vpop.permute.xlu1 %651 }
 0x48f   :  { %v654_v40 = vunpack.i.h.bf16 %v652_v37  ;;  %v653_v41 = vunpack.i.l.bf16 %v652_v37  ;;  %405 = vmatpush.msrb.mxu2 %v388_v38  ;;  %425 = vmatpush.msrb.mxu3 %v389_v39 }
 0x491   :  { %v371_v47 = vsel %vm123_vm11, %v654_v40, %v653_v41  ;;  %v370_v48 = vsel %vm123_vm11, %v653_v41, %v654_v40 }
 0x492   :  { %v374_v49 = vsel %vm922_vm12, %v371_v47, %v364_v43  ;;  %v375_v50 = vsel %vm926_vm13, %v370_v48, %v365_v44  ;;  %v372_v57 = vsel %vm945_vm14, %v364_v43, %v371_v47  ;;  %v373_v2 = vsel %vm953_vm15, %v365_v44, %v370_v48 }
 0x493   :  { %406 = vmatpush.msrb.mxu2 %v374_v49  ;;  %426 = vmatpush.msrb.mxu3 %v375_v50 }
 0x495   :  { %407 = vmatpush.msrb.mxu2 %v326_v60  ;;  %427 = vmatpush.msrb.mxu3 %v327_v62  ;;  %v358_v60 = vsel %vm922_vm12, %v355_v55, %v348_v58  ;;  %v359_v62 = vsel %vm926_vm13, %v354_v56, %v349_v59 }
 0x497   :  { %408 = vmatpush.msrb.mxu2 %v372_v57  ;;  %428 = vmatpush.msrb.mxu3 %v373_v2 }
 0x499   :  { %409 = vmatpush.msrb.mxu2 %v358_v60  ;;  %429 = vmatpush.msrb.mxu3 %v359_v62 }
 0x49b   :  { %410 = vmatpush.msrb.mxu2 %v340_v16  ;;  %430 = vmatpush.msrb.mxu3 %v341_v19 }
 0x49d   :  { %411 = vmatpush.msrb.mxu2 %v356_v4  ;;  %431 = vmatpush.msrb.mxu3 %v357_v5 }
 0x49e   :  { %570 = vmatmul.msk.f32.vlgmr.msrb.gmra.mxu2 %vm173_vm0, %v392_v3  ;;  %571 = vmatmul.msk.f32.vlgmr.msrb.gmra.mxu3 %vm173_vm0, %v392_v3 }
 0x49f   :  { %486 = vmatpush.msra.mxu2 %v807_v35  ;;  %506 = vmatpush.msra.mxu3 %v807_v35 }
 0x4a1   :  { %487 = vmatpush.msra.mxu2 %v807_v35  ;;  %507 = vmatpush.msra.mxu3 %v807_v35 }
 0x4a3   :  { %488 = vmatpush.msra.mxu2 %v807_v35  ;;  %508 = vmatpush.msra.mxu3 %v807_v35 }
 0x4a5   :  { %489 = vmatpush.msra.mxu2 %v807_v35  ;;  %509 = vmatpush.msra.mxu3 %v807_v35 }
 0x4a7   :  { %490 = vmatpush.msra.mxu2 %v807_v35  ;;  %510 = vmatpush.msra.mxu3 %v807_v35 }
 0x4a9   :  { %491 = vmatpush.msra.mxu2 %v807_v35  ;;  %511 = vmatpush.msra.mxu3 %v807_v35 }
 0x4ab   :  { %492 = vmatpush.msra.mxu2 %v807_v35  ;;  %512 = vmatpush.msra.mxu3 %v807_v35 }
 0x4ad   :  { %493 = vmatpush.msra.mxu2 %v807_v35  ;;  %513 = vmatpush.msra.mxu3 %v807_v35 }
 0x4af   :  { %494 = vmatpush.msra.mxu2 %v807_v35  ;;  %514 = vmatpush.msra.mxu3 %v807_v35 }
 0x4b1   :  { %495 = vmatpush.msra.mxu2 %v807_v35  ;;  %515 = vmatpush.msra.mxu3 %v807_v35 }
 0x4b3   :  { %496 = vmatpush.msra.mxu2 %v807_v35  ;;  %516 = vmatpush.msra.mxu3 %v807_v35 }
 0x4b5   :  { %497 = vmatpush.msra.mxu2 %v807_v35  ;;  %517 = vmatpush.msra.mxu3 %v807_v35 }
 0x4b7   :  { %498 = vmatpush.msra.mxu2 %v807_v35  ;;  %518 = vmatpush.msra.mxu3 %v807_v35 }
 0x4b9   :  { %499 = vmatpush.msra.mxu2 %v807_v35  ;;  %519 = vmatpush.msra.mxu3 %v807_v35 }
 0x4bb   :  { %500 = vmatpush.msra.mxu2 %v807_v35  ;;  %520 = vmatpush.msra.mxu3 %v807_v35 }
 0x4bd   :  { %501 = vmatpush.msra.mxu2 %v807_v35  ;;  %521 = vmatpush.msra.mxu3 %v807_v35 }
 0x521   :  { %v413_v9 = vpop.f32.mrf.mxu2  ;;  %v433_v51 = vpop.f32.mrf.mxu3 }
 0x522   :  { %452 = vmatmul.f32.vlgmr.msra.gmra.mxu0 %v413_v9  ;;  %472 = vmatmul.f32.vlgmr.msra.gmra.mxu1 %v433_v51 }
 0x59f   :  { %v453_v52 = vpop.f32.mrf.mxu0  ;;  %v473_v61 = vpop.f32.mrf.mxu1 }
 0x5a0   :  { %v474_v63 = vadd.f32 %v473_v61, %v453_v52 }
 0x5a2   :  { %v476_v6 = vmul.f32 0.00390625, %v474_v63 }
 0x5a4   :  { %479 = vperm.xlu1 %665, %v476_v6  }
 0x616   :  { %v480_v7 = vpop.permute.xlu1 %479 }
 0x617   :  { %v482_v8 = vsub.f32 %v413_v9, %v480_v7  ;;  %v483_v10 = vsub.f32 %v433_v51, %v480_v7 }
 0x619   :  { %v484_v11 = vmul.f32 %v482_v8, %v482_v8  ;;  %v485_v12 = vmul.f32 %v483_v10, %v483_v10 }
 0x61b   :  { %502 = vmatmul.f32.vlgmr.msra.gmra.mxu2 %v484_v11  ;;  %522 = vmatmul.f32.vlgmr.msra.gmra.mxu3 %v485_v12 }
 0x69e   :  { %v503_v13 = vpop.f32.mrf.mxu2  ;;  %v523_v14 = vpop.f32.mrf.mxu3 }
 0x69f   :  { %v524_v15 = vadd.f32 %v523_v14, %v503_v13 }
 0x6a1   :  { %v526_v35 = vmul.f32 0.00390625, %v524_v15 }
 0x6a3   :  { %v527_v16 = vadd.f32 1e-05, %v526_v35 }
 0x6a5   :  { %668 = vrsqrt.f32 %v527_v16  ;;  %vm534_vm3 = vweird.f32 %v527_v16 }
 0x6ab   :  { %v669_v19 = vpop.eup %668 }
 0x6ac   :  { %v529_v20 = vmul.f32 %v669_v19, %v527_v16  ;;  %vm535_vm2 = vweird.f32 %v669_v19 }
 0x6ad   :  { %vm536_vm4 = vmor %vm534_vm3, %vm535_vm2 }
 0x6ae   :  { %v530_v23 = vmul.f32 %v669_v19, %v529_v20 }
 0x6b0   :  { %v531_v17 = vmul.f32 0.5, %v530_v23 }
 0x6b2   :  { %v532_v18 = vsub.f32 1.5, %v531_v17 }
 0x6b4   :  { %v533_v24 = vmul.f32 %v669_v19, %v532_v18 }
 0x6b6   :  { %v537_v21 = vsel %vm536_vm4, %v669_v19, %v533_v24 }
 0x6b7   :  { %540 = vperm.xlu2 %623, %v537_v21  }
 0x711   :  { %v541_v25 = vpop.permute.xlu2 %540 }
 0x712   :  { %v543_v26 = vmul.f32 %v541_v25, %v482_v8  ;;  %v544_v22 = vmul.f32 %v541_v25, %v483_v10 }
 0x714   :  { %v545_v27 = vadd.f32 %v543_v26, %v846_v0  ;;  %v546_v28 = vadd.f32 %v544_v22, %v848_v1 }
 0x716   :  { %547 = vst [vmem:[#allocation10] sm:$0xff] %v545_v27 }
 0x717   :  { %548 = vst [vmem:[#allocation10 + $0x8] sm:$0xff] %v546_v28 }
 0x718   :  { %559 = dma.vmem_to_hbm [thread:$0]  %s555_s10, 256, %s557_s13, [#allocation4]  }
 0x719   :  { %796 = dma.done.wait [#allocation4], 256  }
 0x71a   :  { %797 = vsyncadd [#allocation4], 4294967040 }
 0x71b   :  { %564 = vsyncpa [#allocation3], 1 }
 0x71c   :  { %565 = vsyncpa [#allocation6], 1 }
 0x71d   :  { %566 = vsyncpa [#allocation9], 1 }
 0x71e   :  { %567 = vsyncpa [#allocation4], 1 }

</bundles_post_ra>
